<compile_context>
chip_gen: v6e
topology: v6e:2x2x1
jax: 0.10.0
libtpu: 0.0.40
codegen_flags: <defaults>
</compile_context>

<pallas_src>
import functools

import jax
import jax.numpy as jnp
from jax.experimental import pallas as pl
from jax.experimental.pallas import tpu as pltpu

# CartPole-v1 environment constants
N_STATES = 4      # env.observation_space.shape[0]
N_ACTIONS = 2     # env.action_space.n
HIDDEN = 10

# v7x-safe: 2 bufs x 1024 x 4 x 4B in + 2 x 1024 x 2 x 4B out ≈ 48 KiB << 32 MiB
TILE_B_MAX = 1024


def _round_up(n, m):
    return ((n + m - 1) // m) * m


def net_kernel(x_ref, w1_ref, b1_ref, w2_ref, b2_ref, out_ref):
    # fc1 + ReLU : (TILE_B, N_STATES) @ (N_STATES, HIDDEN) on the MXU, f32 acc
    h = jnp.dot(x_ref[...], w1_ref[...], preferred_element_type=jnp.float32)
    h = jnp.maximum(h + b1_ref[...], 0.0)          # (TILE_B, HIDDEN) + (1, HIDDEN)
    # out layer. NOTE: last dim = N_ACTIONS(=2) < 128 -> masked store (vst.msk);
    # acceptable here since the output tile is tiny relative to the input tile.
    out_ref[...] = (jnp.dot(h, w2_ref[...], preferred_element_type=jnp.float32)
                    + b2_ref[...])                 # (TILE_B, N_ACTIONS)


def prepare_params(w1, b1, w2, b2):
    """One-time conversion from PyTorch layout (out,in) -> kernel layout (in,out)
    plus 2-D biases.  Call once per parameter update, NOT per forward call."""
    return (w1.T,                      # (N_STATES, HIDDEN)
            b1.reshape(1, HIDDEN),
            w2.T,                      # (HIDDEN, N_ACTIONS)
            b2.reshape(1, N_ACTIONS))


@functools.partial(jax.jit, static_argnames=("tile_b_max",))
def net_forward(x, w1_t, b1_2d, w2_t, b2_2d, tile_b_max=TILE_B_MAX):
    """x: (B, N_STATES) f32; params pre-transposed via prepare_params().
    Returns (B, N_ACTIONS) action values."""
    B = x.shape[0]
    tile_b = min(tile_b_max, _round_up(B, 8))      # block rows must be multiple of 8
    b_pad = _round_up(B, tile_b)
    if b_pad != B:
        # fused by jit; keeps block shapes legal for arbitrary B
        x = jnp.pad(x, ((0, b_pad - B), (0, 0)))

    resident = lambda i: (0, 0)                    # weights/biases stay resident in VMEM
    out = pl.pallas_call(
        net_kernel,
        out_shape=jax.ShapeDtypeStruct((b_pad, N_ACTIONS), jnp.float32),
        grid_spec=pltpu.PrefetchScalarGridSpec(
            num_scalar_prefetch=0,
            grid=(b_pad // tile_b,),
            in_specs=[
                pl.BlockSpec((tile_b, N_STATES), lambda i: (i, 0)),
                pl.BlockSpec((N_STATES, HIDDEN), resident),
                pl.BlockSpec((1, HIDDEN), resident),
                pl.BlockSpec((HIDDEN, N_ACTIONS), resident),
                pl.BlockSpec((1, N_ACTIONS), resident),
            ],
            out_specs=pl.BlockSpec((tile_b, N_ACTIONS), lambda i: (i, 0)),
        ),
        compiler_params=pltpu.CompilerParams(
            dimension_semantics=("parallel",),     # batch axis shardable across TCs
        ),
    )(x, w1_t, b1_2d, w2_t, b2_2d)
    return out[:B]


def init_params(key):
    """Deterministic synthetic init mirroring Net.__init__:
    weights ~ N(0, 0.1); biases use PyTorch Linear default U(-1/sqrt(fan_in), +)."""
    k1, k2, k3, k4 = jax.random.split(key, 4)
    w1 = 0.1 * jax.random.normal(k1, (HIDDEN, N_STATES), dtype=jnp.float32)
    w2 = 0.1 * jax.random.normal(k2, (N_ACTIONS, HIDDEN), dtype=jnp.float32)
    b1 = jax.random.uniform(k3, (HIDDEN,), jnp.float32,
                            -1.0 / jnp.sqrt(N_STATES), 1.0 / jnp.sqrt(N_STATES))
    b2 = jax.random.uniform(k4, (N_ACTIONS,), jnp.float32,
                            -1.0 / jnp.sqrt(HIDDEN), 1.0 / jnp.sqrt(HIDDEN))
    return w1, b1, w2, b2


def ref_forward(x, w1, b1, w2, b2):
    h = jnp.maximum(x @ w1.T + b1, 0.0)
    return h @ w2.T + b2


if __name__ == "__main__":
    key = jax.random.PRNGKey(0)
    kx, kp, kx2 = jax.random.split(key, 3)
    w1, b1, w2, b2 = init_params(kp)
    params = prepare_params(w1, b1, w2, b2)        # done once, outside the hot path

    # Case 1: small RL-style batch, single block.
    B = 8
    x = jax.random.normal(kx, (B, N_STATES), dtype=jnp.float32)
    out = jax.block_until_ready(net_forward(x, *params))
    ref = ref_forward(x, w1, b1, w2, b2)
    assert out.shape == (B, N_ACTIONS)
    assert jnp.allclose(out, ref, atol=1e-5, rtol=1e-5)

    # Case 2: B not a multiple of the tile -> exercises padding + a 3-step
    # "parallel" grid (tile_b_max=8 keeps shapes small while covering the
    # multi-block index_map path).
    B2 = 20
    x2 = jax.random.normal(kx2, (B2, N_STATES), dtype=jnp.float32)
    out2 = jax.block_until_ready(net_forward(x2, *params, tile_b_max=8))
    ref2 = ref_forward(x2, w1, b1, w2, b2)
    assert out2.shape == (B2, N_ACTIONS)
    assert jnp.allclose(out2, ref2, atol=1e-5, rtol=1e-5)

    print("KERNEL_OK")
</pallas_src>

<mosaic_0001>
module attributes {stable_mosaic.version = 11 : i64} {
  func.func @net_kernel(%arg0: i32, %arg1: memref<8x4xf32, #tpu.memory_space<vmem>>, %arg2: memref<4x10xf32, #tpu.memory_space<vmem>>, %arg3: memref<1x10xf32, #tpu.memory_space<vmem>>, %arg4: memref<10x2xf32, #tpu.memory_space<vmem>>, %arg5: memref<1x2xf32, #tpu.memory_space<vmem>>, %arg6: memref<8x2xf32, #tpu.memory_space<vmem>>) attributes {dimension_semantics = [#tpu.dimension_semantics<parallel>], iteration_bounds = array<i64: 1>, scalar_prefetch = 0 : i64, scratch_operands = 0 : i64, tpu.core_type = #tpu.core_type<tc>, window_params = [{transform_indices = @transform_0, window_bounds = array<i64: 8, 4>}, {pipeline_mode = #tpu.pipeline_mode<synchronous>, transform_indices = @transform_1, window_bounds = array<i64: 4, 10>}, {pipeline_mode = #tpu.pipeline_mode<synchronous>, transform_indices = @transform_2, window_bounds = array<i64: 1, 10>}, {pipeline_mode = #tpu.pipeline_mode<synchronous>, transform_indices = @transform_3, window_bounds = array<i64: 10, 2>}, {pipeline_mode = #tpu.pipeline_mode<synchronous>, transform_indices = @transform_4, window_bounds = array<i64: 1, 2>}, {transform_indices = @transform_5, window_bounds = array<i64: 8, 2>}]} {
    %c0 = arith.constant 0 : index
    %c0_0 = arith.constant 0 : index
    %0 = vector.load %arg1[%c0, %c0_0] : memref<8x4xf32, #tpu.memory_space<vmem>>, vector<8x4xf32>
    %c0_1 = arith.constant 0 : index
    %c0_2 = arith.constant 0 : index
    %1 = vector.load %arg2[%c0_1, %c0_2] : memref<4x10xf32, #tpu.memory_space<vmem>>, vector<4x10xf32>
    %cst = arith.constant dense<0.000000e+00> : vector<8x10xf32>
    %2 = tpu.matmul %0, %1, %cst {dimension_numbers = #tpu.dot_dimension_numbers<[1], [0], [0], [1], [0, 0, 1, 1], [], []>} : vector<8x4xf32>, vector<4x10xf32>, vector<8x10xf32> -> vector<8x10xf32>
    %c0_3 = arith.constant 0 : index
    %c0_4 = arith.constant 0 : index
    %3 = vector.load %arg3[%c0_3, %c0_4] : memref<1x10xf32, #tpu.memory_space<vmem>>, vector<1x10xf32>
    %4 = vector.broadcast %3 : vector<1x10xf32> to vector<8x10xf32>
    %5 = arith.addf %2, %4 : vector<8x10xf32>
    %cst_5 = arith.constant 0.000000e+00 : f32
    %6 = vector.broadcast %cst_5 : f32 to vector<8x10xf32>
    %7 = arith.maximumf %5, %6 : vector<8x10xf32>
    %c0_6 = arith.constant 0 : index
    %c0_7 = arith.constant 0 : index
    %8 = vector.load %arg4[%c0_6, %c0_7] : memref<10x2xf32, #tpu.memory_space<vmem>>, vector<10x2xf32>
    %cst_8 = arith.constant dense<0.000000e+00> : vector<8x2xf32>
    %9 = tpu.matmul %7, %8, %cst_8 {dimension_numbers = #tpu.dot_dimension_numbers<[1], [0], [0], [1], [0, 0, 1, 1], [], []>} : vector<8x10xf32>, vector<10x2xf32>, vector<8x2xf32> -> vector<8x2xf32>
    %c0_9 = arith.constant 0 : index
    %c0_10 = arith.constant 0 : index
    %10 = vector.load %arg5[%c0_9, %c0_10] : memref<1x2xf32, #tpu.memory_space<vmem>>, vector<1x2xf32>
    %11 = vector.broadcast %10 : vector<1x2xf32> to vector<8x2xf32>
    %12 = arith.addf %9, %11 : vector<8x2xf32>
    %c0_11 = arith.constant 0 : index
    %c0_12 = arith.constant 0 : index
    %13 = vector.load %arg6[%c0_11, %c0_12] : memref<8x2xf32, #tpu.memory_space<vmem>>, vector<8x2xf32>
    tpu.vector_store %arg6[%c0_11, %c0_12], %12 {strides = array<i32>} : memref<8x2xf32, #tpu.memory_space<vmem>>, vector<8x2xf32>,
    return
  }
  func.func @transform_0(%arg0: i32) -> (i32, i32) {
    %c0_i32 = arith.constant 0 : i32
    %c0_i32_0 = arith.constant 0 : i32
    return %arg0, %c0_i32 : i32, i32
  }
  func.func @transform_1(%arg0: i32) -> (i32, i32) {
    %c0_i32 = arith.constant 0 : i32
    %c0_i32_0 = arith.constant 0 : i32
    %c0_i32_1 = arith.constant 0 : i32
    return %c0_i32, %c0_i32_0 : i32, i32
  }
  func.func @transform_2(%arg0: i32) -> (i32, i32) {
    %c0_i32 = arith.constant 0 : i32
    %c0_i32_0 = arith.constant 0 : i32
    %c0_i32_1 = arith.constant 0 : i32
    return %c0_i32, %c0_i32_0 : i32, i32
  }
  func.func @transform_3(%arg0: i32) -> (i32, i32) {
    %c0_i32 = arith.constant 0 : i32
    %c0_i32_0 = arith.constant 0 : i32
    %c0_i32_1 = arith.constant 0 : i32
    return %c0_i32, %c0_i32_0 : i32, i32
  }
  func.func @transform_4(%arg0: i32) -> (i32, i32) {
    %c0_i32 = arith.constant 0 : i32
    %c0_i32_0 = arith.constant 0 : i32
    %c0_i32_1 = arith.constant 0 : i32
    return %c0_i32, %c0_i32_0 : i32, i32
  }
  func.func @transform_5(%arg0: i32) -> (i32, i32) {
    %c0_i32 = arith.constant 0 : i32
    %c0_i32_0 = arith.constant 0 : i32
    return %arg0, %c0_i32 : i32, i32
  }
}

</mosaic_0001>

<bundles_post_ra>
// kernel: net_forward.1
= control target key start
LH: loop header
LB: loop body
LE: loop exit
PB: predicated region body
PF: predicated region fallthrough
CT: control target
= control target key end

     0   :  { %vm33_vm0 = vcmask 1043456   ;;  %vm29_vm1 = vcmask 31744   ;;  %v226_v0 = vmov 0.0   ;;  %vm227_vm2 = vmmov 0   ;;  %s279_s1 = inlined_call_operand.vmem [shape: f32[4,10], index: 1, kind: input, shape index: {}]   ;;  %s280_s0 = inlined_call_operand.vmem [shape: f32[8,4], index: 0, kind: input, shape index: {}]   ;;  %s281_s3 = inlined_call_operand.vmem [shape: f32[10,2], index: 3, kind: input, shape index: {}]   ;;  %s282_s2 = inlined_call_operand.vmem [shape: f32[1,10], index: 2, kind: input, shape index: {}]   ;;  %s283_s4 = inlined_call_operand.vmem [shape: f32[1,2], index: 4, kind: input, shape index: {}]   ;;  %s284_s5 = inlined_call_operand.vmem [shape: f32[8,2], index: 5, kind: output, shape index: {}]  }
   0x1   :  { %212 = vmatprep.subr.mxu0 %v226_v0  ;;  %v21_v1 = vld [vmem:[%s279_s1] sm:$0xf]  ;;  %214 = vmatprep.mubr.msk.f32.mxu0 %vm227_vm2, %v226_v0  ;;  %v109_v3 = vld [vmem:[%s281_s3 + $0x8] sm:$0x3]  ;;  %vm121_vm3 = vcmask 1041408   ;;  %vm117_vm4 = vcmask 80896  }
   0x2   :  { %v20_v2 = vld [vmem:[%s280_s0] sm:$0xff]  ;;  %213 = vmatpush3.msk.msra.mxu0 %vm33_vm0, %v21_v1  ;;  %217 = vmatprep.subr.mxu1 %v226_v0  ;;  %vm195_vm5 = vcmask 15360  }
   0x3   :  { %215 = vmatmul.mubr.msk.f32.vlgmr.msra.gmra.mxu0 %vm29_vm1, %v20_v2  ;;  %221 = vmatprep.mubr.msk.f32.mxu1 %vm227_vm2, %v226_v0  ;;  %v108_v4 = vld [vmem:[%s281_s3] sm:$0xff] }
   0x4   :  { %218 = vmatpush3.msk.msra.mxu1 %vm121_vm3, %v109_v3  ;;  %v201_v5 = vld [vmem:[%s282_s2] ss:$0 sm:$0xff] }
   0x5   :  { %219 = vmatprep.subr.mxu1 %v226_v0  ;;  %v204_v10 = vld [vmem:[%s283_s4] ss:$0 sm:$0xff] }
   0x6   :  { %220 = vmatpush3.msra.mxu1 %v108_v4 }
  0xc3   :  { %v103_v6 = vpop.f32.mrf.mxu0 }
  0xc4   :  { %v104_v7 = vadd.f32 %v201_v5, %v103_v6 }
  0xc5   :  { %v216_v8 = vpop.f32.mrf.mxu0 }
  0xc6   :  { %v107_v9 = vmax.f32 %v104_v7, 0.0 }
  0xc8   :  { %222 = vmatmul.mubr.msk.f32.vlgmr.msra.gmra.mxu1 %vm117_vm4, %v107_v9 }
 0x188   :  { %v191_v11 = vpop.f32.mrf.mxu1 }
 0x189   :  { %v192_v12 = vadd.f32 %v204_v10, %v191_v11 }
 0x18a   :  { %v223_v13 = vpop.f32.mrf.mxu1 }
 0x18b   :  { %196 = vst.msk [vmem:[%s284_s5] sm:$0xff] %vm195_vm5, %v192_v12 }

</bundles_post_ra>
